<compile_context>
chip_gen: v7x
topology: tpu7x:2x2x1
jax: 0.10.0
libtpu: 0.0.40
codegen_flags: <defaults>
</compile_context>

<pallas_src>
import math

import jax
import jax.numpy as jnp
from jax.experimental import pallas as pl
from jax.experimental.pallas import tpu as pltpu


def _minmax_scaler_kernel(x_ref, scale_ref, bias_ref, o_ref):
    # x_ref: (TM, TN), scale_ref/bias_ref: (1, TN) f32, o_ref: (TM, TN)
    dt = x_ref.dtype
    scale = scale_ref[...].astype(dt)   # (1, TN): cast once per step, broadcast below
    bias = bias_ref[...].astype(dt)
    o_ref[...] = (x_ref[...] * scale + bias).astype(o_ref.dtype)


def _round_down8(n):
    return max(8, (n // 8) * 8)


def minmax_scaler_transform(x, a, b, *, target_block_bytes=2 * 1024 * 1024):
    """x: (..., D). a: (D,) training min. b: (D,) training range (max - min)."""
    orig_shape = x.shape
    D = orig_shape[-1]
    x2d = x.reshape(-1, D)
    M = x2d.shape[0]
    itemsize = jnp.dtype(x.dtype).itemsize

    # Fold the affine transform into one FMA:  out = x * (2/b) - (2a/b + 1).
    # Zero-range features (b == 0) get scale 1 (sklearn-style) instead of Inf/NaN.
    b_safe = jnp.where(b == 0, 1.0, b).astype(jnp.float32)
    a32 = a.astype(jnp.float32)
    scale = 2.0 / b_safe
    bias = -(2.0 * a32 / b_safe + 1.0)

    # Lane-dense view of the contiguous (M, D) slab (free under jit: pure reshape):
    #   L = lcm(D, 128), k = L // D original rows per super-row, params tiled to width L.
    if D % 128 == 0:
        k, L = 1, D
    else:
        k = 128 // math.gcd(D, 128)
        L = k * D
    if M >= k and M % k == 0:
        Mv = M // k
        xv = x2d.reshape(Mv, L)
        scale_row = jnp.tile(scale, k).reshape(1, L)
        bias_row = jnp.tile(bias, k).reshape(1, L)
    else:
        # Tail rows don't fill a lane-dense super-row; operate on (M, D) directly.
        # Last-dim block equals the full array dim, so this is legal (stores are masked).
        Mv, L = M, D
        xv = x2d
        scale_row = scale.reshape(1, D)
        bias_row = bias.reshape(1, D)

    # ---- block sizing: ~target_block_bytes per block, (8, 128)-aligned ----------------
    if L % 128 == 0:
        # Full feature width unless the feature dim is so wide that even a 256-row slab
        # would blow the byte budget (then a second grid axis over columns is used).
        max_tn = max(128, (target_block_bytes // (256 * itemsize)) // 128 * 128)
        tn = min(L, max_tn)
    else:
        tn = L
    grid_n = pl.cdiv(L, tn)

    row_bytes = tn * itemsize
    if Mv <= 8:
        tm = Mv                                           # full dim (legal block shape)
    else:
        tm = min(_round_down8(target_block_bytes // row_bytes), _round_down8(Mv))
        if tm >= Mv:
            # Single row step would leave one of v7x's two TensorCores idle.
            tm = _round_down8(pl.cdiv(Mv, 2))
    grid_m = pl.cdiv(Mv, tm)

    block_bytes = tm * tn * itemsize
    # Double-buffered input + output blocks (+ params + margin); raised above v5e's
    # 16 MiB scoped default, capped safely below v7x's 64 MiB physical VMEM.
    vmem_limit = int(min(max(6 * block_bytes + (2 << 20), 32 << 20), 48 << 20))

    cost = pl.CostEstimate(
        flops=2 * M * D,
        transcendentals=0,
        bytes_accessed=2 * M * D * itemsize + 2 * D * 4,
    )

    out = pl.pallas_call(
        _minmax_scaler_kernel,
        out_shape=jax.ShapeDtypeStruct((Mv, L), x.dtype),
        grid_spec=pltpu.PrefetchScalarGridSpec(
            num_scalar_prefetch=0,
            grid=(grid_m, grid_n),
            in_specs=[
                pl.BlockSpec((tm, tn), lambda i, j: (i, j)),   # x tile
                pl.BlockSpec((1, tn), lambda i, j: (0, j)),    # scale (row-invariant)
                pl.BlockSpec((1, tn), lambda i, j: (0, j)),    # bias  (row-invariant)
            ],
            out_specs=pl.BlockSpec((tm, tn), lambda i, j: (i, j)),
        ),
        compiler_params=pltpu.CompilerParams(
            dimension_semantics=("parallel", "parallel"),
            vmem_limit_bytes=vmem_limit,
        ),
        cost_estimate=cost,
    )(xv, scale_row, bias_row)

    return out.reshape(orig_shape)


if __name__ == "__main__":
    key = jax.random.PRNGKey(0)
    k_train, k_x, k_train2, k_x2 = jax.random.split(key, 4)

    fn = jax.jit(minmax_scaler_transform)

    # TODO(synk): MinMaxScaler.fit mutates module buffers; it is a host-side training
    # statistic, not part of forward, so it is computed here in plain JAX.

    # Case 1: dim=32, n=300 — exercises the lane-dense reshape path + ragged row block.
    dim, n_train, n = 32, 64, 300
    X_train = jax.random.uniform(k_train, (n_train, dim), jnp.float32, 0.0, 10.0)
    a = jnp.min(X_train, axis=0)
    b = jnp.max(X_train, axis=0) - jnp.min(X_train, axis=0)
    x = jax.random.uniform(k_x, (n, dim), jnp.float32, 0.0, 10.0)

    out = jax.block_until_ready(fn(x, a, b))
    ref = (x - a[None, :] - b[None, :] / 2.0) / (b[None, :] / 2.0)
    assert out.shape == x.shape
    assert jnp.allclose(out, ref, atol=1e-5, rtol=1e-5)

    # Case 2: dim=20, n=7 — exercises the direct (M, D) fallback path (full-dim blocks).
    dim2, n2 = 20, 7
    X_train2 = jax.random.uniform(k_train2, (16, dim2), jnp.float32, 0.0, 5.0)
    a2 = jnp.min(X_train2, axis=0)
    b2 = jnp.max(X_train2, axis=0) - jnp.min(X_train2, axis=0)
    x2 = jax.random.uniform(k_x2, (n2, dim2), jnp.float32, 0.0, 5.0)

    out2 = jax.block_until_ready(fn(x2, a2, b2))
    ref2 = (x2 - a2[None, :] - b2[None, :] / 2.0) / (b2[None, :] / 2.0)
    assert out2.shape == x2.shape
    assert jnp.allclose(out2, ref2, atol=1e-5, rtol=1e-5)

    print("KERNEL_OK")
</pallas_src>

<mosaic_0001>
module attributes {stable_mosaic.version = 11 : i64} {
  func.func @_minmax_scaler_kernel(%arg0: i32, %arg1: i32, %arg2: memref<72x128xf32, #tpu.memory_space<vmem>>, %arg3: memref<1x128xf32, #tpu.memory_space<vmem>>, %arg4: memref<1x128xf32, #tpu.memory_space<vmem>>, %arg5: memref<72x128xf32, #tpu.memory_space<vmem>>) attributes {dimension_semantics = [#tpu.dimension_semantics<parallel>, #tpu.dimension_semantics<parallel>], iteration_bounds = array<i64: 2, 1>, scalar_prefetch = 0 : i64, scratch_operands = 0 : i64, tpu.core_type = #tpu.core_type<tc>, window_params = [{transform_indices = @transform_0, window_bounds = array<i64: 72, 128>}, {transform_indices = @transform_1, window_bounds = array<i64: 1, 128>}, {transform_indices = @transform_2, window_bounds = array<i64: 1, 128>}, {transform_indices = @transform_3, window_bounds = array<i64: 72, 128>}]} {
    %c0 = arith.constant 0 : index
    %c0_0 = arith.constant 0 : index
    %0 = vector.load %arg3[%c0, %c0_0] : memref<1x128xf32, #tpu.memory_space<vmem>>, vector<1x128xf32>
    %c0_1 = arith.constant 0 : index
    %c0_2 = arith.constant 0 : index
    %1 = vector.load %arg4[%c0_1, %c0_2] : memref<1x128xf32, #tpu.memory_space<vmem>>, vector<1x128xf32>
    %c0_3 = arith.constant 0 : index
    %c0_4 = arith.constant 0 : index
    %2 = vector.load %arg2[%c0_3, %c0_4] : memref<72x128xf32, #tpu.memory_space<vmem>>, vector<72x128xf32>
    %3 = vector.broadcast %0 : vector<1x128xf32> to vector<72x128xf32>
    %4 = arith.mulf %2, %3 : vector<72x128xf32>
    %5 = vector.broadcast %1 : vector<1x128xf32> to vector<72x128xf32>
    %6 = arith.addf %4, %5 : vector<72x128xf32>
    %c0_5 = arith.constant 0 : index
    %c0_6 = arith.constant 0 : index
    %7 = vector.load %arg5[%c0_5, %c0_6] : memref<72x128xf32, #tpu.memory_space<vmem>>, vector<72x128xf32>
    tpu.vector_store %arg5[%c0_5, %c0_6], %6 {strides = array<i32>} : memref<72x128xf32, #tpu.memory_space<vmem>>, vector<72x128xf32>,
    return
  }
  func.func @transform_0(%arg0: i32, %arg1: i32) -> (i32, i32) {
    %c0_i32 = arith.constant 0 : i32
    return %arg0, %arg1 : i32, i32
  }
  func.func @transform_1(%arg0: i32, %arg1: i32) -> (i32, i32) {
    %c0_i32 = arith.constant 0 : i32
    %c0_i32_0 = arith.constant 0 : i32
    return %c0_i32, %arg1 : i32, i32
  }
  func.func @transform_2(%arg0: i32, %arg1: i32) -> (i32, i32) {
    %c0_i32 = arith.constant 0 : i32
    %c0_i32_0 = arith.constant 0 : i32
    return %c0_i32, %arg1 : i32, i32
  }
  func.func @transform_3(%arg0: i32, %arg1: i32) -> (i32, i32) {
    %c0_i32 = arith.constant 0 : i32
    return %arg0, %arg1 : i32, i32
  }
}

</mosaic_0001>

<bundles_post_ra>
// kernel: tile.18
= control target key start
LH: loop header
LB: loop body
LE: loop exit
PB: predicated region body
PF: predicated region fallthrough
CT: control target
= control target key end

     0   :  { %s22_s0 = inlined_call_operand.vmem [shape: f32[32], index: 0, kind: input, shape index: {}]   ;;  %s23_s1 = inlined_call_operand.vmem [shape: f32[4,32], index: 1, kind: output, shape index: {}]  }
   0x1   :  { %v4_v0 = vld [vmem:[%s22_s0] ss:$0 sm:$0xff] }
   0x2   :  { %5 = vst [vmem:[%s23_s1] sm:$0xf] %v4_v0 }

// kernel: tile.19
= control target key start
LH: loop header
LB: loop body
LE: loop exit
PB: predicated region body
PF: predicated region fallthrough
CT: control target
= control target key end

     0   :  { %vm7_vm0 = vcmask 261120   ;;  %s37_s8 = smov 32   ;;  %s38_s9 = smov 64   ;;  %vm13_vm1 = vcmask 1048320   ;;  %vm19_vm2 = vcmask 785920   ;;  %vm25_vm3 = vcmask 523520   ;;  %s55_s0 = inlined_call_operand.vmem [shape: f32[4,32], index: 0, kind: input, shape index: {}]   ;;  %s56_s1 = inlined_call_operand.vmem [shape: f32[1,128], index: 1, kind: output, shape index: {}]  }
   0x1   :  { %v4_v0 = vld [vmem:[%s55_s0] sm:$0xf]  ;;  %s36_s0 = smov 96  }
   0x2   :  { %5 = vst [vmem:[#allocation1] sm:$0xf] %v4_v0 }
   0x9   :  { %v10_v1 = vld [vmem:[#allocation1 + $0x3] sm:$0x1]   ;;  %v22_v2 = vld [vmem:[#allocation1 + $0x1] sm:$0x1]   ;;  %v6_v3 = vld [vmem:[#allocation1] sm:$0x1]  }
   0xa   :  { %11 = vrot.lane.b32.xlu0 %v10_v1, %s36_s0  ;;  %23 = vrot.lane.b32.xlu1 %v22_v2, %s37_s8  ;;  %v16_v4 = vld [vmem:[#allocation1 + $0x2] sm:$0x1]   ;;  %8 = vst.msk [vmem:[#allocation0] sm:$0x1] %vm7_vm0, %v6_v3  }
   0xe   :  { %17 = vrot.lane.b32.xlu0 %v16_v4, %s38_s9 }
  0x7c   :  { %v12_v5 = vpop.permute.xlu0 %11   ;;  %v24_v6 = vpop.permute.xlu1 %23  }
  0x7d   :  { %14 = vst.msk [vmem:[#allocation0] sm:$0x1] %vm13_vm1, %v12_v5  }
  0x80   :  { %v18_v7 = vpop.permute.xlu0 %17  }
  0x81   :  { %20 = vst.msk [vmem:[#allocation0] sm:$0x1] %vm19_vm2, %v18_v7  }
  0x82   :  { %26 = vst.msk [vmem:[#allocation0] sm:$0x1] %vm25_vm3, %v24_v6  }
  0x89   :  { %v30_v8 = vld [vmem:[#allocation0] sm:$0x1] }
  0x8a   :  { %32 = vst [vmem:[%s56_s1] sm:$0x1] %v30_v8 }

// kernel: minmax_scaler_transform.1
= control target key start
LH: loop header
LB: loop body
LE: loop exit
PB: predicated region body
PF: predicated region fallthrough
CT: control target
= control target key end

     0   :  { %s839_s12 = smov 0   ;;  %s841_s13 = smov 0   ;;  %s968_s0 = inlined_call_operand.vmem [shape: f32[75,128], index: 0, kind: input, shape index: {}]   ;;  %s969_s1 = inlined_call_operand.vmem [shape: f32[1,128], index: 1, kind: input, shape index: {}]   ;;  %s970_s2 = inlined_call_operand.vmem [shape: f32[1,128], index: 2, kind: input, shape index: {}]   ;;  %s971_s3 = inlined_call_operand.vmem [shape: f32[75,128], index: 3, kind: output, shape index: {}]  }
   0x1   :  { %s843_s14 = smov 0   ;;  %s845_s15 = smov 0  }
   0x2   :  { %s847_s16 = smov 0  }
   0x3 LB: > { %s582_s17 = sadd.s32 4294967295, %s785_s16   ;;  %s25_s18 = sadd.s32 1, %s781_s15  ;;  %s785_s16 = sphi %s847_s16, %s13_s16   ;;  %s781_s15 = sphi %s845_s15, %s979_s15   ;;  %s777_s14 = sphi %s843_s14, %s978_s14   ;;  %s773_s13 = sphi %s841_s13, %s977_s13   ;;  %s769_s12 = sphi %s839_s12, %s976_s12  }
   0x4   : > { %p27_p0 = scmp.ge.s32.totalorder %s25_s18, 2  ;;  %s114_s19 = sadd.s32 1, %s773_s13 }
   0x5   : > { %p124_p1 = scmp.ne.s32.totalorder %s773_s13, %s769_s12  ;;  %p125_p2 = scmp.eq.s32.totalorder %s582_s17, 1 }
   0x6   : > { %s981_s18 = smov (%p27_p0, %s25_s18), 0  ;;  %p588_p4 = scmp.ge.s32.totalorder %s785_s16, 1 }
   0x7   : > { %p868_p3 = por %p125_p2, %p124_p1  ;;  %s109_s21 = ssub.s32 %s781_s15, %s981_s18 }
   0x8   : > { %p181_p5 = scmp.lt.s32.totalorder %s785_s16, 3  ;;  %p112_p6 = scmp.eq.s32.totalorder %s109_s21, 0 }
   0xa   : > { %p182_p7 = pnand %p588_p4, %p181_p5 }
   0xb   : > { %s877_s22 = scalar_select %p112_p6, %s773_s13, %s114_s19  }
   0xc   : > { %185 = sbr.rel (%p182_p7) target bundleno = 94 (0x5e), region = 32  ;;  %s214_s24 = sand.u32 (!%p182_p7), 1, %s769_s12   ;;  %v590_v0 = vld [vmem:[%s969_s1] ss:$0 sm:$0xff] (!%p182_p7) }
   0xd   : > { %s880_s23 = smul.u32 (!%p182_p7), 9, %s777_s14  ;;  %v591_v1 = vld [vmem:[%s970_s2] ss:$0 sm:$0xff] (!%p182_p7) }
   0xe   : > { %s605_s26 = smul.u32 (!%p182_p7), 72, %s214_s24 }
   0xf   : > { %p222_p8 = scmp.lt.s32.totalorder (!%p182_p7), %s880_s23, 9 }
  0x10   : > { %s893_s8 = scalar_lea.vmem (!%p182_p7), [#allocation2], %s605_s26  }
  0x13   : > { %s223_s25 = scalar_select %p222_p8, %s880_s23, 9 }
  0x14   : > { %s303_s9 = ssub.s32 (%p868_p3), 10, %s880_s23  ;;  %s604_s10 = smul.u32 (%p868_p3), 72, %s777_s14 }
  0x15   : > { %s589_s27 = sshll.u32 %s223_s25, 3  ;;  %p304_p9 = scmp.lt.s32.totalorder (%p868_p3), %s303_s9, 9 }
  0x16   : > { %s228_s5 = scalar_lea.vmem %s968_s0, %s589_s27  ;;  %s911_s17 = scalar_lea.vmem (%p868_p3), %s971_s3, %s604_s10  }
  0x17   : > { %v247_v2 = vld [vmem:[%s228_s5] sm:$0xff]  ;;  %v248_v3 = vld [vmem:[%s228_s5 + $0x8] sm:$0xff]  ;;  %v249_v4 = vld [vmem:[%s228_s5 + $0x10] sm:$0xff] }
  0x18   : > { %v262_v5 = vmul.f32 %v590_v0, %v247_v2  ;;  %v263_v6 = vmul.f32 %v590_v0, %v248_v3  ;;  %v264_v7 = vmul.f32 %v590_v0, %v249_v4  ;;  %v250_v8 = vld [vmem:[%s228_s5 + $0x18] sm:$0xff]  ;;  %v251_v9 = vld [vmem:[%s228_s5 + $0x20] sm:$0xff]  ;;  %v252_v10 = vld [vmem:[%s228_s5 + $0x28] sm:$0xff] }
  0x19   : > { %v265_v11 = vmul.f32 %v590_v0, %v250_v8  ;;  %v266_v12 = vmul.f32 %v590_v0, %v251_v9  ;;  %v267_v13 = vmul.f32 %v590_v0, %v252_v10  ;;  %v253_v14 = vld [vmem:[%s228_s5 + $0x30] sm:$0xff]  ;;  %v254_v15 = vld [vmem:[%s228_s5 + $0x38] sm:$0xff]  ;;  %v255_v16 = vld [vmem:[%s228_s5 + $0x40] sm:$0xff] }
  0x1a   : > { %v277_v17 = vadd.f32 %v591_v1, %v262_v5  ;;  %v278_v18 = vadd.f32 %v591_v1, %v263_v6  ;;  %v279_v19 = vadd.f32 %v591_v1, %v264_v7  ;;  %v268_v20 = vmul.f32 %v590_v0, %v253_v14  ;;  %301 = sbr.rel (!%p868_p3) target bundleno = 94 (0x5e), region = 36 }
  0x1b   : > { %v280_v21 = vadd.f32 %v591_v1, %v265_v11  ;;  %v281_v22 = vadd.f32 %v591_v1, %v266_v12  ;;  %v282_v23 = vadd.f32 %v591_v1, %v267_v13  ;;  %v269_v24 = vmul.f32 %v590_v0, %v254_v15 }
  0x1c   : > { %286 = vst [vmem:[%s893_s8] sm:$0xff] %v277_v17  ;;  %287 = vst [vmem:[%s893_s8 + $0x8] sm:$0xff] %v278_v18  ;;  %v283_v25 = vadd.f32 %v591_v1, %v268_v20  ;;  %v270_v26 = vmul.f32 %v590_v0, %v255_v16 }
  0x1d   : > { %288 = vst [vmem:[%s893_s8 + $0x10] sm:$0xff] %v279_v19  ;;  %289 = vst [vmem:[%s893_s8 + $0x18] sm:$0xff] %v280_v21  ;;  %v284_v27 = vadd.f32 %v591_v1, %v269_v24 }
  0x1e   : > { %290 = vst [vmem:[%s893_s8 + $0x20] sm:$0xff] %v281_v22  ;;  %291 = vst [vmem:[%s893_s8 + $0x28] sm:$0xff] %v282_v23  ;;  %v285_v28 = vadd.f32 %v591_v1, %v270_v26 }
  0x1f   : > { %292 = vst [vmem:[%s893_s8 + $0x30] sm:$0xff] %v283_v25  ;;  %293 = vst [vmem:[%s893_s8 + $0x38] sm:$0xff] %v284_v27 }
  0x20   : > { %294 = vst [vmem:[%s893_s8 + $0x40] sm:$0xff] %v285_v28 }
  0x21   : > { %s983_s9 = smov (!%p304_p9, %s303_s9), 9 }
  0x22   : > { %s592_s19 = sshll.u32 %s983_s9, 7 }
  0x23   : > { %p595_p10 = scmp.eq.s32.totalorder %s592_s19, 0 }
  0x24   : > { %711 = sdivrem.u32 (!%p595_p10), %s983_s9, 9 }
  0x25   : > { %313 = sbr.rel (%p595_p10) target bundleno = 94 (0x5e), region = 40 }
  0x2d   : > { %s917_s20 = spop.drf %711 }
  0x2e   : > { %p596_p11 = scmp.le.s32.totalorder %s917_s20, 0 }
  0x2f   : > { %s973_s14 = smov (!%p596_p11), %s911_s17  ;;  %s974_s21 = smov (!%p596_p11), %s893_s8 }
  0x30   : > { %512 = sbr.rel (%p596_p11) target bundleno = 65 (0x41), region = 122  ;;  %s926_s23 = smov (!%p596_p11), 0  }
  0x31   : > { %s928_s24 = smov (!%p596_p11), 0  }
  0x37 LB: >> { %v393_v29 = vld [vmem:[%s793_s21] sm:$0xff]  ;;  %v395_v30 = vld [vmem:[%s793_s21 + $0x8] sm:$0xff]  ;;  %v397_v31 = vld [vmem:[%s793_s21 + $0x10] sm:$0xff]  ;;  %s411_s25 = sadd.s32 1, %s797_s23  ;;  %s387_s24 = sadd.s32 1, %s801_s24   ;;  %s801_s24 = sphi %s928_s24, %s387_s24   ;;  %s797_s23 = sphi %s926_s23, %s975_s23   ;;  %s793_s21 = sphi %s974_s21, %s416_s21   ;;  %s789_s14 = sphi %s973_s14, %s417_s14  }
  0x38   : >> { %394 = vst [vmem:[%s789_s14] sm:$0xff] %v393_v29  ;;  %396 = vst [vmem:[%s789_s14 + $0x8] sm:$0xff] %v395_v30  ;;  %v399_v32 = vld [vmem:[%s793_s21 + $0x18] sm:$0xff]  ;;  %v401_v33 = vld [vmem:[%s793_s21 + $0x20] sm:$0xff]  ;;  %p412_p12 = scmp.ge.s32.totalorder %s411_s25, %s917_s20  ;;  %p386_p13 = scmp.ge.s32.totalorder %s387_s24, %s917_s20 }
  0x39   : >> { %398 = vst [vmem:[%s789_s14 + $0x10] sm:$0xff] %v397_v31  ;;  %v403_v34 = vld [vmem:[%s793_s21 + $0x28] sm:$0xff]  ;;  %400 = vst [vmem:[%s789_s14 + $0x18] sm:$0xff] %v399_v32  ;;  %v405_v35 = vld [vmem:[%s793_s21 + $0x30] sm:$0xff] }
  0x3a   : >> { %402 = vst [vmem:[%s789_s14 + $0x20] sm:$0xff] %v401_v33  ;;  %404 = vst [vmem:[%s789_s14 + $0x28] sm:$0xff] %v403_v34  ;;  %v407_v36 = vld [vmem:[%s793_s21 + $0x38] sm:$0xff]  ;;  %v409_v37 = vld [vmem:[%s793_s21 + $0x40] sm:$0xff]  ;;  %s985_s25 = smov (%p412_p12, %s411_s25), 0  ;;  %389 = sbr.rel (!%p386_p13) target bundleno = 55 (0x37), region = 128 }
  0x3b   : >> { %406 = vst [vmem:[%s789_s14 + $0x30] sm:$0xff] %v405_v35  ;;  %408 = vst [vmem:[%s789_s14 + $0x38] sm:$0xff] %v407_v36  ;;  %s414_s26 = smul.u32 72, %s985_s25  ;;  %s975_s23 = smov %s985_s25 }
  0x3c   : >> { %410 = vst [vmem:[%s789_s14 + $0x40] sm:$0xff] %v409_v37 }
  0x3d   : >> { %s416_s21 = scalar_lea.vmem %s893_s8, %s414_s26 [#allocation2]   ;;  %s417_s14 = scalar_lea.vmem %s911_s17, %s414_s26  }
  0x41 PF: > { %713 = sdivrem.u32 %s983_s9, 9 }
  0x42   : > { %s597_s27 = smul.u32 72, %s917_s20 }
  0x44   : > { %s422_s28 = scalar_lea.vmem %s893_s8, %s597_s27 [#allocation2]   ;;  %s424_s29 = scalar_lea.vmem %s911_s17, %s597_s27  }
  0x4a   : > { %s714_s30 = spop.drf %713 }
  0x4b   : > { %p599_p0 = scmp.le.s32.totalorder %s714_s30, 0 }
  0x4c   : > { %s803_s4 = smov (!%p599_p0), %s424_s29   ;;  %s807_s5 = smov (!%p599_p0), %s422_s28  }
  0x4d   : > { %526 = sbr.rel (%p599_p0) target bundleno = 94 (0x5e), region = 133  ;;  %s811_s6 = smov (!%p599_p0), 0  }
  0x4e   : > { %s815_s7 = smov (!%p599_p0), 0  }
  0x54 LB: >> { %v434_v38 = vld [vmem:[%s809_s5] sm:$0xff]  ;;  %s436_s10 = sadd.s32 1, %s813_s6  ;;  %s428_s7 = sadd.s32 1, %s817_s7   ;;  %s817_s7 = sphi %s815_s7, %s428_s7   ;;  %s813_s6 = sphi %s811_s6, %s812_s6   ;;  %s809_s5 = sphi %s807_s5, %s441_s5   ;;  %s805_s4 = sphi %s803_s4, %s442_s4  }
  0x55   : >> { %435 = vst [vmem:[%s805_s4] sm:$0xff] %v434_v38  ;;  %p437_p1 = scmp.ge.s32.totalorder %s436_s10, %s714_s30  ;;  %p427_p2 = scmp.ge.s32.totalorder %s428_s7, %s714_s30 }
  0x57   : >> { %s987_s10 = smov (%p437_p1, %s436_s10), 0  ;;  %430 = sbr.rel (!%p427_p2) target bundleno = 84 (0x54), region = 139 }
  0x58   : >> { %s600_s8 = sshll.u32 %s987_s10, 3  ;;  %s812_s6 = smov %s987_s10  }
  0x59   : >> { %s441_s5 = scalar_lea.vmem %s422_s28, %s600_s8 [#allocation2]   ;;  %s442_s4 = scalar_lea.vmem %s424_s29, %s600_s8  }
  0x5e PF: > { %s13_s16 = sadd.s32 1, %s785_s16   ;;  %s976_s12 = smov %s773_s13 }
  0x5f   : > { %p10_p3 = scmp.ge.s32.totalorder %s13_s16, 4   ;;  %s977_s13 = smov %s877_s22 }
  0x60   : > { %s978_s14 = smov %s781_s15  ;;  %s979_s15 = smov %s981_s18 }
  0x61   :  { %12 = sbr.rel (!%p10_p3) target bundleno = 3 (0x3), region = 150 }

</bundles_post_ra>
